<compile_context>
chip_gen: v6e
topology: v6e:2x2x1
jax: 0.10.0
libtpu: 0.0.40
codegen_flags: <defaults>
</compile_context>

<pallas_src>
import jax
import jax.numpy as jnp
from jax.experimental import pallas as pl
from jax.experimental.pallas import tpu as pltpu


def _linear_kernel(x_ref, w_ref, b_ref, o_ref):
    # x_ref: (TB, D) VMEM tile (streamed / double-buffered over the batch grid)
    # w_ref: (1, D)  VMEM, constant index_map -> resident across grid steps
    # b_ref: (1, 1)  SMEM scalar
    # o_ref: (1, TB) VMEM, lane-dense output row for this tile
    x = x_ref[...]
    w = w_ref[...]
    b = b_ref[0, 0]
    # Contract the feature axis of both operands: (1, D) . (TB, D) -> (1, TB).
    # The result is produced directly in the lane-dense layout of o_ref.
    y = jax.lax.dot_general(
        w, x,
        dimension_numbers=(((1,), (1,)), ((), ())),
        preferred_element_type=jnp.float32,
    )
    o_ref[...] = (y + b).astype(o_ref.dtype)


def _round_up(n, m):
    return -(-n // m) * m


def _choose_block_rows(B, D):
    """Pick the batch-tile size TB.

    Large tiles amortize the ~0.35us/step overhead; the double-buffered x tile
    (2 * TB * D * 4 bytes) must stay comfortably inside VMEM on every
    generation (v7x has only 64 MiB per TensorCore).
    """
    target = 512                                   # ~85% of HBM roofline regime
    per_tile_budget = 8 << 20                      # bytes for ONE x tile (2x buffered)
    max_rows = max(128, (per_tile_budget // (D * 4)) // 128 * 128)
    tb = min(target, max_rows)                     # multiple of 128 when multi-tile
    b8 = _round_up(B, 8)
    if b8 <= tb:
        return b8                                  # single tile: block == padded array
    return tb


def linear_regressor_forward(x, weight, bias):
    """Pallas equivalent of nn.Linear(input_dim, 1)(x).squeeze().

    Args:
      x:      (B, D) float32
      weight: (1, D) float32  (PyTorch nn.Linear weight layout, used as-is)
      bias:   (1,)   float32
    Returns:
      (B,) float32
    """
    B, D = x.shape
    tb = _choose_block_rows(B, D)
    B_pad = _round_up(B, tb)
    num_tiles = B_pad // tb

    x_p = x if B_pad == B else jnp.pad(x, ((0, B_pad - B), (0, 0)))
    b_smem = bias.reshape(1, 1).astype(jnp.float32)

    # Explicit VMEM budget (double-buffered x tile + out tile + weight + slack).
    x_tile_bytes = tb * D * 4
    out_tile_bytes = tb * 4
    vmem_limit = int(min(
        48 << 20,
        max(16 << 20, 2 * (x_tile_bytes + out_tile_bytes) + D * 4 + (1 << 20)),
    ))

    out = pl.pallas_call(
        _linear_kernel,
        out_shape=jax.ShapeDtypeStruct((1, B_pad), jnp.float32),
        grid_spec=pl.GridSpec(
            grid=(num_tiles,),
            in_specs=[
                pl.BlockSpec((tb, D), lambda i: (i, 0)),                # x: streamed tiles
                pl.BlockSpec((1, D), lambda i: (0, 0)),                 # weight: resident
                pl.BlockSpec(memory_space=pltpu.MemorySpace.SMEM),      # bias: SMEM scalar
            ],
            out_specs=pl.BlockSpec((1, tb), lambda i: (0, i)),          # lane-dense row
        ),
        compiler_params=pltpu.CompilerParams(
            dimension_semantics=("parallel",),
            vmem_limit_bytes=vmem_limit,
        ),
    )(x_p, weight, b_smem)

    # torch's .squeeze() on (B, 1) -> (B,)
    return out[0, :B]


if __name__ == "__main__":
    key = jax.random.PRNGKey(0)
    k_x, k_w, k_b = jax.random.split(key, 3)

    B, D = 8, 32  # small shapes consistent with nn.Linear(input_dim=32, 1)

    x = jax.random.normal(k_x, (B, D), dtype=jnp.float32)

    # Deterministic parameter init (PyTorch-style uniform(-1/sqrt(D), 1/sqrt(D)))
    bound = 1.0 / jnp.sqrt(jnp.float32(D))
    weight = jax.random.uniform(k_w, (1, D), dtype=jnp.float32,
                                minval=-bound, maxval=bound)
    bias = jax.random.uniform(k_b, (1,), dtype=jnp.float32,
                              minval=-bound, maxval=bound)

    y = linear_regressor_forward(x, weight, bias)
    jax.block_until_ready(y)

    # Reference check in plain JAX
    y_ref = (x @ weight.T + bias).squeeze()
    assert y.shape == (B,)
    assert jnp.allclose(y, y_ref, atol=1e-5), "mismatch vs reference"

    print("KERNEL_OK")
</pallas_src>

<mosaic_0001>
module attributes {stable_mosaic.version = 11 : i64} {
  func.func @_linear_kernel(%arg0: i32, %arg1: memref<8x32xf32, #tpu.memory_space<vmem>>, %arg2: memref<1x32xf32, #tpu.memory_space<vmem>>, %arg3: memref<1x1xf32, #tpu.memory_space<smem>>, %arg4: memref<1x8xf32, #tpu.memory_space<vmem>>) attributes {dimension_semantics = [#tpu.dimension_semantics<parallel>], iteration_bounds = array<i64: 1>, scalar_prefetch = 0 : i64, scratch_operands = 0 : i64, tpu.core_type = #tpu.core_type<tc>, window_params = [{transform_indices = @transform_0, window_bounds = array<i64: 8, 32>}, {pipeline_mode = #tpu.pipeline_mode<synchronous>, transform_indices = @transform_1, window_bounds = array<i64: 1, 32>}, {transform_indices = @transform_2, window_bounds = array<i64: 1, 1>}, {transform_indices = @transform_3, window_bounds = array<i64: 1, 8>}]} {
    %c0 = arith.constant 0 : index
    %c0_0 = arith.constant 0 : index
    %0 = vector.load %arg1[%c0, %c0_0] : memref<8x32xf32, #tpu.memory_space<vmem>>, vector<8x32xf32>
    %c0_1 = arith.constant 0 : index
    %c0_2 = arith.constant 0 : index
    %1 = vector.load %arg2[%c0_1, %c0_2] : memref<1x32xf32, #tpu.memory_space<vmem>>, vector<1x32xf32>
    %c0_3 = arith.constant 0 : index
    %c0_4 = arith.constant 0 : index
    %2 = memref.load %arg3[%c0_3, %c0_4] : memref<1x1xf32, #tpu.memory_space<smem>>
    %cst = arith.constant dense<0.000000e+00> : vector<1x8xf32>
    %3 = tpu.matmul %1, %0, %cst {dimension_numbers = #tpu.dot_dimension_numbers<[1], [1], [0], [0], [0, 0, 1, 0], [], []>} : vector<1x32xf32>, vector<8x32xf32>, vector<1x8xf32> -> vector<1x8xf32>
    %4 = vector.broadcast %2 : f32 to vector<1x8xf32>
    %5 = arith.addf %3, %4 : vector<1x8xf32>
    %c0_5 = arith.constant 0 : index
    %c0_6 = arith.constant 0 : index
    %6 = vector.load %arg4[%c0_5, %c0_6] : memref<1x8xf32, #tpu.memory_space<vmem>>, vector<1x8xf32>
    tpu.vector_store %arg4[%c0_5, %c0_6], %5 {strides = array<i32>} : memref<1x8xf32, #tpu.memory_space<vmem>>, vector<1x8xf32>,
    return
  }
  func.func @transform_0(%arg0: i32) -> (i32, i32) {
    %c0_i32 = arith.constant 0 : i32
    %c0_i32_0 = arith.constant 0 : i32
    return %arg0, %c0_i32 : i32, i32
  }
  func.func @transform_1(%arg0: i32) -> (i32, i32) {
    %c0_i32 = arith.constant 0 : i32
    %c0_i32_0 = arith.constant 0 : i32
    %c0_i32_1 = arith.constant 0 : i32
    return %c0_i32, %c0_i32_0 : i32, i32
  }
  func.func @transform_2(%arg0: i32) -> (i32, i32) {
    %c0_i32 = arith.constant 0 : i32
    %c0_i32_0 = arith.constant 0 : i32
    %c0_i32_1 = arith.constant 0 : i32
    return %c0_i32, %c0_i32_0 : i32, i32
  }
  func.func @transform_3(%arg0: i32) -> (i32, i32) {
    %c0_i32 = arith.constant 0 : i32
    %c0_i32_0 = arith.constant 0 : i32
    return %c0_i32, %arg0 : i32, i32
  }
}

</mosaic_0001>

<bundles_post_ra>
// kernel: tpu_custom_call.1
= control target key start
LH: loop header
LB: loop body
LE: loop exit
PB: predicated region body
PF: predicated region fallthrough
CT: control target
= control target key end

     0   :  { %9 = vsyncpa [#allocation4], 0  ;;  %s219_s0 = inlined_call_operand.hbm [shape: f32[8,32], index: 0, kind: input, shape index: {}]   ;;  %s220_s1 = inlined_call_operand.vmem [shape: f32[1,32], index: 1, kind: input, shape index: {}]   ;;  %s221_s2 = inlined_call_operand.<no memory space> [shape: f32[1,1], index: 2, kind: input, shape index: {}]   ;;  %s222_s3 = inlined_call_operand.hbm [shape: f32[1,8], index: 3, kind: output, shape index: {}]  }
   0x1   :  { %10 = vsyncpa [#allocation5], 0  ;;  %s183_s12 = smov [#allocation3]  }
   0x2   :  { %s17_s13 = sshll.u32 %s183_s12, 4  ;;  %s18_s13 = int_to_ptr.vmem [resolvable:$true] %s17_s13 }
   0x3   :  { %s147_s14 = scalar_lea.vmem %s18_s13, 128  ;;  %p152_p1 = scmp.lt.s32.totalorder %s18_s13, %s18_s13 }
   0x4   :  { %p148_p0 = scmp.ne.s32.totalorder %s18_s13, %s147_s14  ;;  %p153_p2 = scmp.lt.s32.totalorder %s147_s14, %s147_s14 }
   0x6   :  { %p154_p3 = por %p153_p2, %p152_p1 }
   0x8   :  { %p155_p4 = pnand %p154_p3, %p148_p0 }
   0xa   :  { %158 = shalt.err (!%p155_p4)
}
   0xb   :  { %20 = dma.hbm_to_vmem [thread:$0]  %s219_s0, 128, %s18_s13, [#allocation4]  }
   0xc   :  { %179 = dma.done.wait [#allocation4], 128  }
   0xd   :  { %180 = vsyncadd [#allocation4], 4294967168  ;;  %v184_v0 = vmov 0.0   ;;  %vm185_vm0 = vmmov 0   ;;  %vm32_vm1 = vcmask 261120   ;;  %v28_v1 = vld [vmem:[#allocation3] sm:$0xff]  ;;  %v31_v3 = vstv %s221_s2 }
   0xe   :  { %130 = vmatprep.subr.mxu0 %v184_v0  ;;  %132 = vmatprep.mubr.msk.f32.mxu0 %vm185_vm0, %v184_v0  ;;  %v29_v2 = vld [vmem:[%s220_s1] sm:$0x1]  ;;  %s186_s21 = smov [#allocation6]   ;;  %vm109_vm2 = vcmask 57344  }
   0xf   :  { %131 = vmatpush3.xpose.msk.msra.mxu0 %vm32_vm1, %v28_v1  ;;  %s117_s0 = sshll.u32 %s186_s21, 4  ;;  %s118_s0 = int_to_ptr.vmem [resolvable:$true] %s117_s0 }
  0x10   :  { %s159_s22 = scalar_lea.vmem %s118_s0, 16  ;;  %s163_s23 = scalar_lea.vmem %s118_s0, 32 }
  0x11   :  { %p160_p5 = scmp.ne.s32.totalorder %s118_s0, %s159_s22  ;;  %p164_p6 = scmp.lt.s32.totalorder %s118_s0, %s118_s0 }
  0x12   :  { %133 = vmatmul.mubr.msk.f32.vlgmr.msra.gmra.mxu0 %vm32_vm1, %v29_v2  ;;  %p165_p7 = scmp.lt.s32.totalorder %s163_s23, %s159_s22 }
  0x14   :  { %p166_p8 = por %p165_p7, %p164_p6 }
  0x16   :  { %p167_p9 = pnand %p166_p8, %p160_p5 }
  0xd2   :  { %v105_v4 = vpop.f32.mrf.mxu0 }
  0xd3   :  { %v106_v5 = vadd.f32 %v105_v4, %v31_v3 }
  0xd4   :  { %v134_v6 = vpop.f32.mrf.mxu0 }
  0xd5   :  { %110 = vst.msk [vmem:[#allocation6] sm:$0x1] %vm109_vm2, %v106_v5 }
  0xd6   :  { %170 = shalt.err (!%p167_p9)
}
  0xd7   :  { %120 = dma.vmem_to_hbm [thread:$0]  %s118_s0, 16, %s222_s3, [#allocation5]  }
  0xd8   :  { %181 = dma.done.wait [#allocation5], 16  }
  0xd9   :  { %182 = vsyncadd [#allocation5], 4294967280 }
  0xda   :  { %124 = vsyncpa [#allocation4], 1 }
  0xdb   :  { %125 = vsyncpa [#allocation5], 1 }

</bundles_post_ra>
